<compile_context>
chip_gen: v7x
topology: tpu7x:2x2x1
jax: 0.10.0
libtpu: 0.0.40
codegen_flags: <defaults>
</compile_context>

<pallas_src>
import math
import numpy as np
import jax
import jax.numpy as jnp
from jax import lax
from jax.experimental import pallas as pl
from jax.experimental.pallas import tpu as pltpu

# Problem sizes (small, consistent with the module's shapes)
S = 8        # sequence length
N = 2        # batch (independent attention groups -> grid axis)
E = 32       # hidden_dim
H = 4        # num_head
D = E // H   # head_dim
FF = 64      # dim_feedforward
EPS = 1e-5   # LayerNorm eps (PyTorch default)


def encoder_layer_kernel(src_ref, pos_ref,
                         wqkv_ref, bqkv_ref, wo_ref, bo_ref,
                         w1_ref, b1_ref, w2_ref, b2_ref,
                         g1_ref, be1_ref, g2_ref, be2_ref,
                         out_ref):
    """One grid step = one batch element: (S, E) tokens, full layer in-kernel."""
    x = src_ref[0]                          # (S, E) f32
    x_pe = x + pos_ref[0]                   # q = k = with_pos_embed(src, pos)

    # ---- fused QKV projection: one (2S, E) x (E, 3E) MXU matmul --------------
    # rows [0:S]  -> src+pos  (used for q, k)
    # rows [S:2S] -> src      (used for v; value projection uses src WITHOUT pos)
    stacked = jnp.concatenate([x_pe, x], axis=0).astype(jnp.bfloat16)      # (2S, E)
    proj = jnp.dot(stacked, wqkv_ref[...],
                   preferred_element_type=jnp.float32) + bqkv_ref[...]     # (2S, 3E) f32
    q = proj[:S, 0:E].astype(jnp.bfloat16)        # q-scale folded into wqkv/bqkv
    k = proj[:S, E:2 * E].astype(jnp.bfloat16)
    v = proj[S:, 2 * E:3 * E].astype(jnp.bfloat16)

    # ---- attention scores, all heads; fused cross-head softmax ---------------
    score_tiles = []
    for h in range(H):                             # static unroll, H = 4
        qh = q[:, h * D:(h + 1) * D]               # (S, D) bf16
        kh = k[:, h * D:(h + 1) * D]               # (S, D) bf16
        # qh @ kh^T without an explicit wrapper transpose (contract last dims)
        score_tiles.append(
            lax.dot_general(qh, kh, (((1,), (1,)), ((), ())),
                            preferred_element_type=jnp.float32))           # (S, S) f32
    s = jnp.concatenate(score_tiles, axis=0)       # (H*S, S) f32, one softmax pass
    s = s - jnp.max(s, axis=-1, keepdims=True)
    e = jnp.exp(s)
    a = (e * pl.reciprocal(jnp.sum(e, axis=-1, keepdims=True),
                           approx=True)).astype(jnp.bfloat16)              # (H*S, S)

    # ---- AV + output projection: accumulate each head directly into Wo -------
    attn = jnp.zeros((S, E), jnp.float32)
    for h in range(H):
        ah = a[h * S:(h + 1) * S, :]                                        # (S, S) bf16
        oh = jnp.dot(ah, v[:, h * D:(h + 1) * D],
                     preferred_element_type=jnp.float32)                    # (S, D) f32
        attn = attn + jnp.dot(oh.astype(jnp.bfloat16),
                              wo_ref[h * D:(h + 1) * D, :],
                              preferred_element_type=jnp.float32)           # (S, E) f32
    attn = attn + bo_ref[...]

    # ---- residual + LayerNorm 1 (f32 elementwise) ----------------------------
    y = x + attn
    mu = jnp.mean(y, axis=-1, keepdims=True)
    var = jnp.mean((y - mu) ** 2, axis=-1, keepdims=True)
    y = (y - mu) * lax.rsqrt(var + EPS) * g1_ref[...] + be1_ref[...]

    # ---- feed-forward: linear1 -> ReLU -> linear2 ----------------------------
    h1 = jnp.dot(y.astype(jnp.bfloat16), w1_ref[...],
                 preferred_element_type=jnp.float32) + b1_ref[...]
    h1 = jnp.maximum(h1, 0.0)
    h2 = jnp.dot(h1.astype(jnp.bfloat16), w2_ref[...],
                 preferred_element_type=jnp.float32) + b2_ref[...]

    # ---- residual + LayerNorm 2 (f32 elementwise) ----------------------------
    z = y + h2
    mu2 = jnp.mean(z, axis=-1, keepdims=True)
    var2 = jnp.mean((z - mu2) ** 2, axis=-1, keepdims=True)
    out_ref[0] = (z - mu2) * lax.rsqrt(var2 + EPS) * g2_ref[...] + be2_ref[...]


@jax.jit
def transformer_encoder_layer(src_sne, pos_sne, params):
    """src_sne / pos_sne: (S, N, E) float32, PyTorch seq-first layout."""
    (wqkv, bqkv, wo, bo, w1, b1, w2, b2, g1, be1, g2, be2) = params

    # One-time weight prep (folded by jit; in production hoist outside the call
    # path entirely): transpose so the kernel does x @ W, fold the 1/sqrt(D)
    # query scale into the q columns/bias, cast MXU operands to bf16.
    scale = 1.0 / math.sqrt(D)
    wqkv_t = jnp.transpose(wqkv)                       # (E, 3E) f32
    wqkv_t = wqkv_t.at[:, 0:E].multiply(scale).astype(jnp.bfloat16)
    bqkv_f = bqkv.reshape(1, 3 * E).at[:, 0:E].multiply(scale)   # [bq*s | bk | bv] f32
    wo_t = jnp.transpose(wo).astype(jnp.bfloat16)      # (E, E)
    w1_t = jnp.transpose(w1).astype(jnp.bfloat16)      # (E, FF)
    w2_t = jnp.transpose(w2).astype(jnp.bfloat16)      # (FF, E)

    # Batch-major activation layout so each grid step gets one contiguous
    # (1, S, E) block (tiny transpose, fused by jit).
    src_nse = jnp.transpose(src_sne, (1, 0, 2))        # (N, S, E)
    pos_nse = jnp.transpose(pos_sne, (1, 0, 2))

    act_spec = pl.BlockSpec((1, S, E), lambda n: (n, 0, 0))
    wspec = lambda shape: pl.BlockSpec(shape, lambda n: (0, 0))  # grid-invariant: resident

    out = pl.pallas_call(
        encoder_layer_kernel,
        out_shape=jax.ShapeDtypeStruct((N, S, E), jnp.float32),
        grid=(N,),                                     # one step per batch/window element
        in_specs=[
            act_spec, act_spec,                        # src, pos (batch-major)
            wspec((E, 3 * E)), wspec((1, 3 * E)),      # in_proj weight^T (q-scaled), bias
            wspec((E, E)), wspec((1, E)),              # out_proj weight^T, bias
            wspec((E, FF)), wspec((1, FF)),            # linear1 weight^T, bias
            wspec((FF, E)), wspec((1, E)),             # linear2 weight^T, bias
            wspec((1, E)), wspec((1, E)),              # norm1 gamma, beta
            wspec((1, E)), wspec((1, E)),              # norm2 gamma, beta
        ],
        out_specs=act_spec,
        compiler_params=pltpu.CompilerParams(dimension_semantics=("parallel",)),
    )(src_nse, pos_nse, wqkv_t, bqkv_f, wo_t, bo, w1_t, b1, w2_t, b2,
      g1, be1, g2, be2)

    return jnp.transpose(out, (1, 0, 2))               # back to (S, N, E)


def reference(src_sne, pos_sne, params):
    """Pure-JAX reference replicating PyTorch semantics (eval mode)."""
    (wqkv, bqkv, wo, bo, w1, b1, w2, b2, g1, be1, g2, be2) = params
    hp = lax.Precision.HIGHEST
    x = jnp.transpose(src_sne, (1, 0, 2))
    p = jnp.transpose(pos_sne, (1, 0, 2))
    xpe = x + p
    q = jnp.einsum('nse,fe->nsf', xpe, wqkv[:E], precision=hp) + bqkv[0]
    k = jnp.einsum('nse,fe->nsf', xpe, wqkv[E:2 * E], precision=hp) + bqkv[1]
    v = jnp.einsum('nse,fe->nsf', x, wqkv[2 * E:], precision=hp) + bqkv[2]
    q = q / math.sqrt(D)
    qh, kh, vh = (t.reshape(N, S, H, D) for t in (q, k, v))
    s = jnp.einsum('nshd,nthd->nhst', qh, kh, precision=hp)
    a = jax.nn.softmax(s, axis=-1)
    o = jnp.einsum('nhst,nthd->nshd', a, vh, precision=hp).reshape(N, S, E)
    o = jnp.einsum('nse,fe->nsf', o, wo, precision=hp) + bo[0]
    y = x + o
    y = (y - y.mean(-1, keepdims=True)) / jnp.sqrt(y.var(-1, keepdims=True) + EPS) * g1[0] + be1[0]
    h1 = jax.nn.relu(jnp.einsum('nse,fe->nsf', y, w1, precision=hp) + b1[0])
    h2 = jnp.einsum('nsf,ef->nse', h1, w2, precision=hp) + b2[0]
    z = y + h2
    z = (z - z.mean(-1, keepdims=True)) / jnp.sqrt(z.var(-1, keepdims=True) + EPS) * g2[0] + be2[0]
    return jnp.transpose(z, (1, 0, 2))


if __name__ == "__main__":
    key = jax.random.PRNGKey(0)
    ks = jax.random.split(key, 10)
    sc = 0.05

    src = jax.random.normal(ks[0], (S, N, E), jnp.float32)           # (seq, batch, hidden)
    pos = 0.1 * jax.random.normal(ks[1], (S, N, E), jnp.float32)     # positional embedding

    params = (
        sc * jax.random.normal(ks[2], (3 * E, E), jnp.float32),      # in_proj_weight
        sc * jax.random.normal(ks[3], (3, E), jnp.float32),          # in_proj_bias (q,k,v rows)
        sc * jax.random.normal(ks[4], (E, E), jnp.float32),          # out_proj.weight
        sc * jax.random.normal(ks[5], (1, E), jnp.float32),          # out_proj.bias
        sc * jax.random.normal(ks[6], (FF, E), jnp.float32),         # linear1.weight
        sc * jax.random.normal(ks[7], (1, FF), jnp.float32),         # linear1.bias
        sc * jax.random.normal(ks[8], (E, FF), jnp.float32),         # linear2.weight
        sc * jax.random.normal(ks[9], (1, E), jnp.float32),          # linear2.bias
        jnp.ones((1, E), jnp.float32),                               # norm1.weight
        jnp.zeros((1, E), jnp.float32),                              # norm1.bias
        jnp.ones((1, E), jnp.float32),                               # norm2.weight
        jnp.zeros((1, E), jnp.float32),                              # norm2.bias
    )

    out = transformer_encoder_layer(src, pos, params)
    jax.block_until_ready(out)

    ref = reference(src, pos, params)
    np.testing.assert_allclose(np.asarray(out), np.asarray(ref), atol=2e-2, rtol=2e-2)

    print("KERNEL_OK")
</pallas_src>

<mosaic_0001>
module attributes {stable_mosaic.version = 11 : i64} {
  func.func @encoder_layer_kernel(%arg0: i32, %arg1: memref<1x8x32xf32, #tpu.memory_space<vmem>>, %arg2: memref<1x8x32xf32, #tpu.memory_space<vmem>>, %arg3: memref<32x96xbf16, #tpu.memory_space<vmem>>, %arg4: memref<1x96xf32, #tpu.memory_space<vmem>>, %arg5: memref<32x32xbf16, #tpu.memory_space<vmem>>, %arg6: memref<1x32xf32, #tpu.memory_space<vmem>>, %arg7: memref<32x64xbf16, #tpu.memory_space<vmem>>, %arg8: memref<1x64xf32, #tpu.memory_space<vmem>>, %arg9: memref<64x32xbf16, #tpu.memory_space<vmem>>, %arg10: memref<1x32xf32, #tpu.memory_space<vmem>>, %arg11: memref<1x32xf32, #tpu.memory_space<vmem>>, %arg12: memref<1x32xf32, #tpu.memory_space<vmem>>, %arg13: memref<1x32xf32, #tpu.memory_space<vmem>>, %arg14: memref<1x32xf32, #tpu.memory_space<vmem>>, %arg15: memref<1x8x32xf32, #tpu.memory_space<vmem>>) attributes {dimension_semantics = [#tpu.dimension_semantics<parallel>], iteration_bounds = array<i64: 2>, scalar_prefetch = 0 : i64, scratch_operands = 0 : i64, tpu.core_type = #tpu.core_type<tc>, window_params = [{transform_indices = @transform_0, window_bounds = array<i64: 1, 8, 32>}, {transform_indices = @transform_1, window_bounds = array<i64: 1, 8, 32>}, {pipeline_mode = #tpu.pipeline_mode<synchronous>, transform_indices = @transform_2, window_bounds = array<i64: 32, 96>}, {pipeline_mode = #tpu.pipeline_mode<synchronous>, transform_indices = @transform_3, window_bounds = array<i64: 1, 96>}, {pipeline_mode = #tpu.pipeline_mode<synchronous>, transform_indices = @transform_4, window_bounds = array<i64: 32, 32>}, {pipeline_mode = #tpu.pipeline_mode<synchronous>, transform_indices = @transform_5, window_bounds = array<i64: 1, 32>}, {pipeline_mode = #tpu.pipeline_mode<synchronous>, transform_indices = @transform_6, window_bounds = array<i64: 32, 64>}, {pipeline_mode = #tpu.pipeline_mode<synchronous>, transform_indices = @transform_7, window_bounds = array<i64: 1, 64>}, {pipeline_mode = #tpu.pipeline_mode<synchronous>, transform_indices = @transform_8, window_bounds = array<i64: 64, 32>}, {pipeline_mode = #tpu.pipeline_mode<synchronous>, transform_indices = @transform_9, window_bounds = array<i64: 1, 32>}, {pipeline_mode = #tpu.pipeline_mode<synchronous>, transform_indices = @transform_10, window_bounds = array<i64: 1, 32>}, {pipeline_mode = #tpu.pipeline_mode<synchronous>, transform_indices = @transform_11, window_bounds = array<i64: 1, 32>}, {pipeline_mode = #tpu.pipeline_mode<synchronous>, transform_indices = @transform_12, window_bounds = array<i64: 1, 32>}, {pipeline_mode = #tpu.pipeline_mode<synchronous>, transform_indices = @transform_13, window_bounds = array<i64: 1, 32>}, {transform_indices = @transform_14, window_bounds = array<i64: 1, 8, 32>}]} {
    %c0 = arith.constant 0 : index
    %c0_0 = arith.constant 0 : index
    %c0_1 = arith.constant 0 : index
    %0 = vector.load %arg1[%c0, %c0_0, %c0_1] : memref<1x8x32xf32, #tpu.memory_space<vmem>>, vector<1x8x32xf32>
    %1 = vector.shape_cast %0 : vector<1x8x32xf32> to vector<8x32xf32>
    %c0_2 = arith.constant 0 : index
    %c0_3 = arith.constant 0 : index
    %c0_4 = arith.constant 0 : index
    %2 = vector.load %arg2[%c0_2, %c0_3, %c0_4] : memref<1x8x32xf32, #tpu.memory_space<vmem>>, vector<1x8x32xf32>
    %3 = vector.shape_cast %2 : vector<1x8x32xf32> to vector<8x32xf32>
    %4 = arith.addf %1, %3 : vector<8x32xf32>
    %5 = tpu.concatenate %4, %1 in 0 : vector<8x32xf32>, vector<8x32xf32> -> vector<16x32xf32>
    %6 = arith.truncf %5 : vector<16x32xf32> to vector<16x32xbf16>
    %c0_5 = arith.constant 0 : index
    %c0_6 = arith.constant 0 : index
    %7 = vector.load %arg3[%c0_5, %c0_6] : memref<32x96xbf16, #tpu.memory_space<vmem>>, vector<32x96xbf16>
    %cst = arith.constant dense<0.000000e+00> : vector<16x96xf32>
    %8 = tpu.matmul %6, %7, %cst {dimension_numbers = #tpu.dot_dimension_numbers<[1], [0], [0], [1], [0, 0, 1, 1], [], []>} : vector<16x32xbf16>, vector<32x96xbf16>, vector<16x96xf32> -> vector<16x96xf32>
    %c0_7 = arith.constant 0 : index
    %c0_8 = arith.constant 0 : index
    %9 = vector.load %arg4[%c0_7, %c0_8] : memref<1x96xf32, #tpu.memory_space<vmem>>, vector<1x96xf32>
    %10 = vector.broadcast %9 : vector<1x96xf32> to vector<16x96xf32>
    %11 = arith.addf %8, %10 : vector<16x96xf32>
    %12 = vector.extract_strided_slice %11 {offsets = [0, 0], sizes = [8, 32], strides = [1, 1]} : vector<16x96xf32> to vector<8x32xf32>
    %13 = arith.truncf %12 : vector<8x32xf32> to vector<8x32xbf16>
    %14 = vector.extract_strided_slice %11 {offsets = [0, 32], sizes = [8, 32], strides = [1, 1]} : vector<16x96xf32> to vector<8x32xf32>
    %15 = arith.truncf %14 : vector<8x32xf32> to vector<8x32xbf16>
    %16 = vector.extract_strided_slice %11 {offsets = [8, 64], sizes = [8, 32], strides = [1, 1]} : vector<16x96xf32> to vector<8x32xf32>
    %17 = arith.truncf %16 : vector<8x32xf32> to vector<8x32xbf16>
    %18 = vector.extract_strided_slice %13 {offsets = [0, 0], sizes = [8, 8], strides = [1, 1]} : vector<8x32xbf16> to vector<8x8xbf16>
    %19 = vector.extract_strided_slice %15 {offsets = [0, 0], sizes = [8, 8], strides = [1, 1]} : vector<8x32xbf16> to vector<8x8xbf16>
    %cst_9 = arith.constant dense<0.000000e+00> : vector<8x8xf32>
    %20 = tpu.matmul %18, %19, %cst_9 {dimension_numbers = #tpu.dot_dimension_numbers<[1], [1], [0], [0], [0, 0, 1, 0], [], []>} : vector<8x8xbf16>, vector<8x8xbf16>, vector<8x8xf32> -> vector<8x8xf32>
    %21 = vector.extract_strided_slice %13 {offsets = [0, 8], sizes = [8, 8], strides = [1, 1]} : vector<8x32xbf16> to vector<8x8xbf16>
    %22 = vector.extract_strided_slice %15 {offsets = [0, 8], sizes = [8, 8], strides = [1, 1]} : vector<8x32xbf16> to vector<8x8xbf16>
    %cst_10 = arith.constant dense<0.000000e+00> : vector<8x8xf32>
    %23 = tpu.matmul %21, %22, %cst_10 {dimension_numbers = #tpu.dot_dimension_numbers<[1], [1], [0], [0], [0, 0, 1, 0], [], []>} : vector<8x8xbf16>, vector<8x8xbf16>, vector<8x8xf32> -> vector<8x8xf32>
    %24 = vector.extract_strided_slice %13 {offsets = [0, 16], sizes = [8, 8], strides = [1, 1]} : vector<8x32xbf16> to vector<8x8xbf16>
    %25 = vector.extract_strided_slice %15 {offsets = [0, 16], sizes = [8, 8], strides = [1, 1]} : vector<8x32xbf16> to vector<8x8xbf16>
    %cst_11 = arith.constant dense<0.000000e+00> : vector<8x8xf32>
    %26 = tpu.matmul %24, %25, %cst_11 {dimension_numbers = #tpu.dot_dimension_numbers<[1], [1], [0], [0], [0, 0, 1, 0], [], []>} : vector<8x8xbf16>, vector<8x8xbf16>, vector<8x8xf32> -> vector<8x8xf32>
    %27 = vector.extract_strided_slice %13 {offsets = [0, 24], sizes = [8, 8], strides = [1, 1]} : vector<8x32xbf16> to vector<8x8xbf16>
    %28 = vector.extract_strided_slice %15 {offsets = [0, 24], sizes = [8, 8], strides = [1, 1]} : vector<8x32xbf16> to vector<8x8xbf16>
    %cst_12 = arith.constant dense<0.000000e+00> : vector<8x8xf32>
    %29 = tpu.matmul %27, %28, %cst_12 {dimension_numbers = #tpu.dot_dimension_numbers<[1], [1], [0], [0], [0, 0, 1, 0], [], []>} : vector<8x8xbf16>, vector<8x8xbf16>, vector<8x8xf32> -> vector<8x8xf32>
    %30 = tpu.concatenate %20, %23, %26, %29 in 0 : vector<8x8xf32>, vector<8x8xf32>, vector<8x8xf32>, vector<8x8xf32> -> vector<32x8xf32>
    %cst_13 = arith.constant dense<0xFF800000> : vector<32xf32>
    %31 = vector.multi_reduction <maximumf>, %30, %cst_13 [1] : vector<32x8xf32> to vector<32xf32>
    %32 = vector.shape_cast %31 : vector<32xf32> to vector<32x1xf32>
    %33 = vector.broadcast %32 : vector<32x1xf32> to vector<32x8xf32>
    %34 = arith.subf %30, %33 : vector<32x8xf32>
    %35 = math.exp %34 : vector<32x8xf32>
    %cst_14 = arith.constant dense<0.000000e+00> : vector<32xf32>
    %36 = vector.multi_reduction <add>, %35, %cst_14 [1] : vector<32x8xf32> to vector<32xf32>
    %37 = vector.shape_cast %36 : vector<32xf32> to vector<32x1xf32>
    %38 = tpu.reciprocal %37 {approx = true} : vector<32x1xf32> -> vector<32x1xf32>
    %39 = vector.broadcast %38 : vector<32x1xf32> to vector<32x8xf32>
    %40 = arith.mulf %35, %39 : vector<32x8xf32>
    %41 = arith.truncf %40 : vector<32x8xf32> to vector<32x8xbf16>
    %cst_15 = arith.constant 0.000000e+00 : f32
    %42 = vector.broadcast %cst_15 : f32 to vector<8x32xf32>
    %43 = vector.extract_strided_slice %41 {offsets = [0, 0], sizes = [8, 8], strides = [1, 1]} : vector<32x8xbf16> to vector<8x8xbf16>
    %44 = vector.extract_strided_slice %17 {offsets = [0, 0], sizes = [8, 8], strides = [1, 1]} : vector<8x32xbf16> to vector<8x8xbf16>
    %cst_16 = arith.constant dense<0.000000e+00> : vector<8x8xf32>
    %45 = tpu.matmul %43, %44, %cst_16 {dimension_numbers = #tpu.dot_dimension_numbers<[1], [0], [0], [1], [0, 0, 1, 1], [], []>} : vector<8x8xbf16>, vector<8x8xbf16>, vector<8x8xf32> -> vector<8x8xf32>
    %46 = arith.truncf %45 : vector<8x8xf32> to vector<8x8xbf16>
    %c0_17 = arith.constant 0 : index
    %c0_18 = arith.constant 0 : index
    %47 = vector.load %arg5[%c0_17, %c0_18] : memref<32x32xbf16, #tpu.memory_space<vmem>>, vector<8x32xbf16>
    %cst_19 = arith.constant dense<0.000000e+00> : vector<8x32xf32>
    %48 = tpu.matmul %46, %47, %cst_19 {dimension_numbers = #tpu.dot_dimension_numbers<[1], [0], [0], [1], [0, 0, 1, 1], [], []>} : vector<8x8xbf16>, vector<8x32xbf16>, vector<8x32xf32> -> vector<8x32xf32>
    %49 = arith.addf %42, %48 : vector<8x32xf32>
    %50 = vector.extract_strided_slice %41 {offsets = [8, 0], sizes = [8, 8], strides = [1, 1]} : vector<32x8xbf16> to vector<8x8xbf16>
    %51 = vector.extract_strided_slice %17 {offsets = [0, 8], sizes = [8, 8], strides = [1, 1]} : vector<8x32xbf16> to vector<8x8xbf16>
    %cst_20 = arith.constant dense<0.000000e+00> : vector<8x8xf32>
    %52 = tpu.matmul %50, %51, %cst_20 {dimension_numbers = #tpu.dot_dimension_numbers<[1], [0], [0], [1], [0, 0, 1, 1], [], []>} : vector<8x8xbf16>, vector<8x8xbf16>, vector<8x8xf32> -> vector<8x8xf32>
    %53 = arith.truncf %52 : vector<8x8xf32> to vector<8x8xbf16>
    %c8 = arith.constant 8 : index
    %c0_21 = arith.constant 0 : index
    %54 = vector.load %arg5[%c8, %c0_21] : memref<32x32xbf16, #tpu.memory_space<vmem>>, vector<8x32xbf16>
    %cst_22 = arith.constant dense<0.000000e+00> : vector<8x32xf32>
    %55 = tpu.matmul %53, %54, %cst_22 {dimension_numbers = #tpu.dot_dimension_numbers<[1], [0], [0], [1], [0, 0, 1, 1], [], []>} : vector<8x8xbf16>, vector<8x32xbf16>, vector<8x32xf32> -> vector<8x32xf32>
    %56 = arith.addf %49, %55 : vector<8x32xf32>
    %57 = vector.extract_strided_slice %41 {offsets = [16, 0], sizes = [8, 8], strides = [1, 1]} : vector<32x8xbf16> to vector<8x8xbf16>
    %58 = vector.extract_strided_slice %17 {offsets = [0, 16], sizes = [8, 8], strides = [1, 1]} : vector<8x32xbf16> to vector<8x8xbf16>
    %cst_23 = arith.constant dense<0.000000e+00> : vector<8x8xf32>
    %59 = tpu.matmul %57, %58, %cst_23 {dimension_numbers = #tpu.dot_dimension_numbers<[1], [0], [0], [1], [0, 0, 1, 1], [], []>} : vector<8x8xbf16>, vector<8x8xbf16>, vector<8x8xf32> -> vector<8x8xf32>
    %60 = arith.truncf %59 : vector<8x8xf32> to vector<8x8xbf16>
    %c16 = arith.constant 16 : index
    %c0_24 = arith.constant 0 : index
    %61 = vector.load %arg5[%c16, %c0_24] : memref<32x32xbf16, #tpu.memory_space<vmem>>, vector<8x32xbf16>
    %cst_25 = arith.constant dense<0.000000e+00> : vector<8x32xf32>
    %62 = tpu.matmul %60, %61, %cst_25 {dimension_numbers = #tpu.dot_dimension_numbers<[1], [0], [0], [1], [0, 0, 1, 1], [], []>} : vector<8x8xbf16>, vector<8x32xbf16>, vector<8x32xf32> -> vector<8x32xf32>
    %63 = arith.addf %56, %62 : vector<8x32xf32>
    %64 = vector.extract_strided_slice %41 {offsets = [24, 0], sizes = [8, 8], strides = [1, 1]} : vector<32x8xbf16> to vector<8x8xbf16>
    %65 = vector.extract_strided_slice %17 {offsets = [0, 24], sizes = [8, 8], strides = [1, 1]} : vector<8x32xbf16> to vector<8x8xbf16>
    %cst_26 = arith.constant dense<0.000000e+00> : vector<8x8xf32>
    %66 = tpu.matmul %64, %65, %cst_26 {dimension_numbers = #tpu.dot_dimension_numbers<[1], [0], [0], [1], [0, 0, 1, 1], [], []>} : vector<8x8xbf16>, vector<8x8xbf16>, vector<8x8xf32> -> vector<8x8xf32>
    %67 = arith.truncf %66 : vector<8x8xf32> to vector<8x8xbf16>
    %c24 = arith.constant 24 : index
    %c0_27 = arith.constant 0 : index
    %68 = vector.load %arg5[%c24, %c0_27] : memref<32x32xbf16, #tpu.memory_space<vmem>>, vector<8x32xbf16>
    %cst_28 = arith.constant dense<0.000000e+00> : vector<8x32xf32>
    %69 = tpu.matmul %67, %68, %cst_28 {dimension_numbers = #tpu.dot_dimension_numbers<[1], [0], [0], [1], [0, 0, 1, 1], [], []>} : vector<8x8xbf16>, vector<8x32xbf16>, vector<8x32xf32> -> vector<8x32xf32>
    %70 = arith.addf %63, %69 : vector<8x32xf32>
    %c0_29 = arith.constant 0 : index
    %c0_30 = arith.constant 0 : index
    %71 = vector.load %arg6[%c0_29, %c0_30] : memref<1x32xf32, #tpu.memory_space<vmem>>, vector<1x32xf32>
    %72 = vector.broadcast %71 : vector<1x32xf32> to vector<8x32xf32>
    %73 = arith.addf %70, %72 : vector<8x32xf32>
    %74 = arith.addf %1, %73 : vector<8x32xf32>
    %cst_31 = arith.constant dense<0.000000e+00> : vector<8xf32>
    %75 = vector.multi_reduction <add>, %74, %cst_31 [1] : vector<8x32xf32> to vector<8xf32>
    %76 = vector.shape_cast %75 : vector<8xf32> to vector<8x1xf32>
    %cst_32 = arith.constant 3.200000e+01 : f32
    %77 = vector.broadcast %cst_32 : f32 to vector<8x1xf32>
    %78 = arith.divf %76, %77 : vector<8x1xf32>
    %79 = vector.broadcast %78 : vector<8x1xf32> to vector<8x32xf32>
    %80 = arith.subf %74, %79 : vector<8x32xf32>
    %81 = arith.mulf %80, %80 : vector<8x32xf32>
    %cst_33 = arith.constant dense<0.000000e+00> : vector<8xf32>
    %82 = vector.multi_reduction <add>, %81, %cst_33 [1] : vector<8x32xf32> to vector<8xf32>
    %83 = vector.shape_cast %82 : vector<8xf32> to vector<8x1xf32>
    %cst_34 = arith.constant 3.200000e+01 : f32
    %84 = vector.broadcast %cst_34 : f32 to vector<8x1xf32>
    %85 = arith.divf %83, %84 : vector<8x1xf32>
    %86 = vector.broadcast %78 : vector<8x1xf32> to vector<8x32xf32>
    %87 = arith.subf %74, %86 : vector<8x32xf32>
    %cst_35 = arith.constant 9.99999974E-6 : f32
    %88 = vector.broadcast %cst_35 : f32 to vector<8x1xf32>
    %89 = arith.addf %85, %88 : vector<8x1xf32>
    %90 = math.rsqrt %89 : vector<8x1xf32>
    %91 = vector.broadcast %90 : vector<8x1xf32> to vector<8x32xf32>
    %92 = arith.mulf %87, %91 : vector<8x32xf32>
    %c0_36 = arith.constant 0 : index
    %c0_37 = arith.constant 0 : index
    %93 = vector.load %arg11[%c0_36, %c0_37] : memref<1x32xf32, #tpu.memory_space<vmem>>, vector<1x32xf32>
    %94 = vector.broadcast %93 : vector<1x32xf32> to vector<8x32xf32>
    %95 = arith.mulf %92, %94 : vector<8x32xf32>
    %c0_38 = arith.constant 0 : index
    %c0_39 = arith.constant 0 : index
    %96 = vector.load %arg12[%c0_38, %c0_39] : memref<1x32xf32, #tpu.memory_space<vmem>>, vector<1x32xf32>
    %97 = vector.broadcast %96 : vector<1x32xf32> to vector<8x32xf32>
    %98 = arith.addf %95, %97 : vector<8x32xf32>
    %99 = arith.truncf %98 : vector<8x32xf32> to vector<8x32xbf16>
    %c0_40 = arith.constant 0 : index
    %c0_41 = arith.constant 0 : index
    %100 = vector.load %arg7[%c0_40, %c0_41] : memref<32x64xbf16, #tpu.memory_space<vmem>>, vector<32x64xbf16>
    %cst_42 = arith.constant dense<0.000000e+00> : vector<8x64xf32>
    %101 = tpu.matmul %99, %100, %cst_42 {dimension_numbers = #tpu.dot_dimension_numbers<[1], [0], [0], [1], [0, 0, 1, 1], [], []>} : vector<8x32xbf16>, vector<32x64xbf16>, vector<8x64xf32> -> vector<8x64xf32>
    %c0_43 = arith.constant 0 : index
    %c0_44 = arith.constant 0 : index
    %102 = vector.load %arg8[%c0_43, %c0_44] : memref<1x64xf32, #tpu.memory_space<vmem>>, vector<1x64xf32>
    %103 = vector.broadcast %102 : vector<1x64xf32> to vector<8x64xf32>
    %104 = arith.addf %101, %103 : vector<8x64xf32>
    %cst_45 = arith.constant 0.000000e+00 : f32
    %105 = vector.broadcast %cst_45 : f32 to vector<8x64xf32>
    %106 = arith.maximumf %104, %105 : vector<8x64xf32>
    %107 = arith.truncf %106 : vector<8x64xf32> to vector<8x64xbf16>
    %c0_46 = arith.constant 0 : index
    %c0_47 = arith.constant 0 : index
    %108 = vector.load %arg9[%c0_46, %c0_47] : memref<64x32xbf16, #tpu.memory_space<vmem>>, vector<64x32xbf16>
    %cst_48 = arith.constant dense<0.000000e+00> : vector<8x32xf32>
    %109 = tpu.matmul %107, %108, %cst_48 {dimension_numbers = #tpu.dot_dimension_numbers<[1], [0], [0], [1], [0, 0, 1, 1], [], []>} : vector<8x64xbf16>, vector<64x32xbf16>, vector<8x32xf32> -> vector<8x32xf32>
    %c0_49 = arith.constant 0 : index
    %c0_50 = arith.constant 0 : index
    %110 = vector.load %arg10[%c0_49, %c0_50] : memref<1x32xf32, #tpu.memory_space<vmem>>, vector<1x32xf32>
    %111 = vector.broadcast %110 : vector<1x32xf32> to vector<8x32xf32>
    %112 = arith.addf %109, %111 : vector<8x32xf32>
    %113 = arith.addf %98, %112 : vector<8x32xf32>
    %cst_51 = arith.constant dense<0.000000e+00> : vector<8xf32>
    %114 = vector.multi_reduction <add>, %113, %cst_51 [1] : vector<8x32xf32> to vector<8xf32>
    %115 = vector.shape_cast %114 : vector<8xf32> to vector<8x1xf32>
    %cst_52 = arith.constant 3.200000e+01 : f32
    %116 = vector.broadcast %cst_52 : f32 to vector<8x1xf32>
    %117 = arith.divf %115, %116 : vector<8x1xf32>
    %118 = vector.broadcast %117 : vector<8x1xf32> to vector<8x32xf32>
    %119 = arith.subf %113, %118 : vector<8x32xf32>
    %120 = arith.mulf %119, %119 : vector<8x32xf32>
    %cst_53 = arith.constant dense<0.000000e+00> : vector<8xf32>
    %121 = vector.multi_reduction <add>, %120, %cst_53 [1] : vector<8x32xf32> to vector<8xf32>
    %122 = vector.shape_cast %121 : vector<8xf32> to vector<8x1xf32>
    %cst_54 = arith.constant 3.200000e+01 : f32
    %123 = vector.broadcast %cst_54 : f32 to vector<8x1xf32>
    %124 = arith.divf %122, %123 : vector<8x1xf32>
    %125 = vector.broadcast %117 : vector<8x1xf32> to vector<8x32xf32>
    %126 = arith.subf %113, %125 : vector<8x32xf32>
    %cst_55 = arith.constant 9.99999974E-6 : f32
    %127 = vector.broadcast %cst_55 : f32 to vector<8x1xf32>
    %128 = arith.addf %124, %127 : vector<8x1xf32>
    %129 = math.rsqrt %128 : vector<8x1xf32>
    %130 = vector.broadcast %129 : vector<8x1xf32> to vector<8x32xf32>
    %131 = arith.mulf %126, %130 : vector<8x32xf32>
    %c0_56 = arith.constant 0 : index
    %c0_57 = arith.constant 0 : index
    %132 = vector.load %arg13[%c0_56, %c0_57] : memref<1x32xf32, #tpu.memory_space<vmem>>, vector<1x32xf32>
    %133 = vector.broadcast %132 : vector<1x32xf32> to vector<8x32xf32>
    %134 = arith.mulf %131, %133 : vector<8x32xf32>
    %c0_58 = arith.constant 0 : index
    %c0_59 = arith.constant 0 : index
    %135 = vector.load %arg14[%c0_58, %c0_59] : memref<1x32xf32, #tpu.memory_space<vmem>>, vector<1x32xf32>
    %136 = vector.broadcast %135 : vector<1x32xf32> to vector<8x32xf32>
    %137 = arith.addf %134, %136 : vector<8x32xf32>
    %c0_60 = arith.constant 0 : index
    %c0_61 = arith.constant 0 : index
    %c0_62 = arith.constant 0 : index
    %138 = vector.load %arg15[%c0_60, %c0_61, %c0_62] : memref<1x8x32xf32, #tpu.memory_space<vmem>>, vector<1x8x32xf32>
    %139 = vector.shape_cast %138 : vector<1x8x32xf32> to vector<8x32xf32>
    %140 = vector.shape_cast %137 : vector<8x32xf32> to vector<1x8x32xf32>
    tpu.vector_store %arg15[%c0_60, %c0_61, %c0_62], %140 {strides = array<i32>} : memref<1x8x32xf32, #tpu.memory_space<vmem>>, vector<1x8x32xf32>,
    return
  }
  func.func @transform_0(%arg0: i32) -> (i32, i32, i32) {
    %c0_i32 = arith.constant 0 : i32
    %c0_i32_0 = arith.constant 0 : i32
    %c0_i32_1 = arith.constant 0 : i32
    return %arg0, %c0_i32, %c0_i32_0 : i32, i32, i32
  }
  func.func @transform_1(%arg0: i32) -> (i32, i32, i32) {
    %c0_i32 = arith.constant 0 : i32
    %c0_i32_0 = arith.constant 0 : i32
    %c0_i32_1 = arith.constant 0 : i32
    return %arg0, %c0_i32, %c0_i32_0 : i32, i32, i32
  }
  func.func @transform_2(%arg0: i32) -> (i32, i32) {
    %c0_i32 = arith.constant 0 : i32
    %c0_i32_0 = arith.constant 0 : i32
    %c0_i32_1 = arith.constant 0 : i32
    return %c0_i32, %c0_i32_0 : i32, i32
  }
  func.func @transform_3(%arg0: i32) -> (i32, i32) {
    %c0_i32 = arith.constant 0 : i32
    %c0_i32_0 = arith.constant 0 : i32
    %c0_i32_1 = arith.constant 0 : i32
    return %c0_i32, %c0_i32_0 : i32, i32
  }
  func.func @transform_4(%arg0: i32) -> (i32, i32) {
    %c0_i32 = arith.constant 0 : i32
    %c0_i32_0 = arith.constant 0 : i32
    %c0_i32_1 = arith.constant 0 : i32
    return %c0_i32, %c0_i32_0 : i32, i32
  }
  func.func @transform_5(%arg0: i32) -> (i32, i32) {
    %c0_i32 = arith.constant 0 : i32
    %c0_i32_0 = arith.constant 0 : i32
    %c0_i32_1 = arith.constant 0 : i32
    return %c0_i32, %c0_i32_0 : i32, i32
  }
  func.func @transform_6(%arg0: i32) -> (i32, i32) {
    %c0_i32 = arith.constant 0 : i32
    %c0_i32_0 = arith.constant 0 : i32
    %c0_i32_1 = arith.constant 0 : i32
    return %c0_i32, %c0_i32_0 : i32, i32
  }
  func.func @transform_7(%arg0: i32) -> (i32, i32) {
    %c0_i32 = arith.constant 0 : i32
    %c0_i32_0 = arith.constant 0 : i32
    %c0_i32_1 = arith.constant 0 : i32
    return %c0_i32, %c0_i32_0 : i32, i32
  }
  func.func @transform_8(%arg0: i32) -> (i32, i32) {
    %c0_i32 = arith.constant 0 : i32
    %c0_i32_0 = arith.constant 0 : i32
    %c0_i32_1 = arith.constant 0 : i32
    return %c0_i32, %c0_i32_0 : i32, i32
  }
  func.func @transform_9(%arg0: i32) -> (i32, i32) {
    %c0_i32 = arith.constant 0 : i32
    %c0_i32_0 = arith.constant 0 : i32
    %c0_i32_1 = arith.constant 0 : i32
    return %c0_i32, %c0_i32_0 : i32, i32
  }
  func.func @transform_10(%arg0: i32) -> (i32, i32) {
    %c0_i32 = arith.constant 0 : i32
    %c0_i32_0 = arith.constant 0 : i32
    %c0_i32_1 = arith.constant 0 : i32
    return %c0_i32, %c0_i32_0 : i32, i32
  }
  func.func @transform_11(%arg0: i32) -> (i32, i32) {
    %c0_i32 = arith.constant 0 : i32
    %c0_i32_0 = arith.constant 0 : i32
    %c0_i32_1 = arith.constant 0 : i32
    return %c0_i32, %c0_i32_0 : i32, i32
  }
  func.func @transform_12(%arg0: i32) -> (i32, i32) {
    %c0_i32 = arith.constant 0 : i32
    %c0_i32_0 = arith.constant 0 : i32
    %c0_i32_1 = arith.constant 0 : i32
    return %c0_i32, %c0_i32_0 : i32, i32
  }
  func.func @transform_13(%arg0: i32) -> (i32, i32) {
    %c0_i32 = arith.constant 0 : i32
    %c0_i32_0 = arith.constant 0 : i32
    %c0_i32_1 = arith.constant 0 : i32
    return %c0_i32, %c0_i32_0 : i32, i32
  }
  func.func @transform_14(%arg0: i32) -> (i32, i32, i32) {
    %c0_i32 = arith.constant 0 : i32
    %c0_i32_0 = arith.constant 0 : i32
    %c0_i32_1 = arith.constant 0 : i32
    return %arg0, %c0_i32, %c0_i32_0 : i32, i32, i32
  }
}

</mosaic_0001>

<bundles_post_ra>
// kernel: transformer_encoder_layer.1
= control target key start
LH: loop header
LB: loop body
LE: loop exit
PB: predicated region body
PF: predicated region fallthrough
CT: control target
= control target key end

     0   :  { %s1801_s29 = smov 0   ;;  %s1984_s0 = inlined_call_operand.vmem [shape: f32[2,8,32], index: 0, kind: input, shape index: {}]   ;;  %s1985_s1 = inlined_call_operand.vmem [shape: f32[2,8,32], index: 1, kind: input, shape index: {}]   ;;  %s1986_s2 = inlined_call_operand.vmem [shape: bf16[32,96], index: 2, kind: input, shape index: {}]   ;;  %s1987_s3 = inlined_call_operand.vmem [shape: f32[1,96], index: 3, kind: input, shape index: {}]   ;;  %s1988_s4 = inlined_call_operand.vmem [shape: bf16[32,32], index: 4, kind: input, shape index: {}]   ;;  %s1989_s5 = inlined_call_operand.vmem [shape: f32[1,32], index: 5, kind: input, shape index: {}]   ;;  %s1990_s6 = inlined_call_operand.vmem [shape: bf16[32,64], index: 6, kind: input, shape index: {}]   ;;  %s1991_s7 = inlined_call_operand.vmem [shape: f32[1,64], index: 7, kind: input, shape index: {}]   ;;  %s1992_s8 = inlined_call_operand.vmem [shape: bf16[64,32], index: 8, kind: input, shape index: {}]   ;;  %s1993_s9 = inlined_call_operand.vmem [shape: f32[1,32], index: 9, kind: input, shape index: {}]   ;;  %s1994_s10 = inlined_call_operand.vmem [shape: f32[1,32], index: 10, kind: input, shape index: {}]   ;;  %s1995_s11 = inlined_call_operand.vmem [shape: f32[1,32], index: 11, kind: input, shape index: {}]   ;;  %s1996_s12 = inlined_call_operand.vmem [shape: f32[1,32], index: 12, kind: input, shape index: {}]   ;;  %s1997_s13 = inlined_call_operand.vmem [shape: f32[1,32], index: 13, kind: input, shape index: {}]   ;;  %s1998_s14 = inlined_call_operand.vmem [shape: f32[2,8,32], index: 14, kind: output, shape index: {}]  }
   0x1 LB: > { %s1480_s30 = sadd.s32 4294967295, %s1711_s29   ;;  %p1484_p0 = scmp.ge.s32.totalorder %s1711_s29, 1  ;;  %s1711_s29 = sphi %s1801_s29, %s24_s29  }
   0x2   : > { %p420_p1 = scmp.lt.s32.totalorder %s1711_s29, 3 }
   0x4   : > { %p421_p2 = pnand %p1484_p0, %p420_p1 }
   0x5   : > { %v1677_v0 = vld [vmem:[%s1986_s2] sm:$0xff] (!%p421_p2)   ;;  %v1713_v1 = vmov (!%p421_p2), 0.0   ;;  %v1678_v2 = vld [vmem:[%s1986_s2 + $0x8] sm:$0xff] (!%p421_p2)   ;;  %vm1714_vm0 = vmmov (!%p421_p2), 0   ;;  %p468_p3 = scmp.lt.s32.totalorder (!%p421_p2), %s1480_s30, 1  ;;  %vm508_vm1 = vcmask (!%p421_p2), 261120  }
   0x6   : > { %424 = sbr.rel (%p421_p2) target bundleno = 2620 (0xa3c), region = 76  ;;  %1556 = vmatprep.subr.bf16.mxu1 (!%p421_p2), %v1713_v1  ;;  %1570 = vmatprep.subr.bf16.mxu0 (!%p421_p2), %v1713_v1  ;;  %v1488_v7 = vld [vmem:[%s1987_s3] ss:$0 sm:$0xff] (!%p421_p2)  ;;  %s1715_s28 = smov (!%p421_p2), 120   ;;  %vm558_vm2 = vcmask (!%p421_p2), 64512   ;;  %vm807_vm3 = vcmask (!%p421_p2), 1043456  }
   0x7   : > { %1557 = vmatpush3.bf16.msra.mxu1 (!%p421_p2), %v1677_v0  ;;  %1560 = vmatprep.mubr.msk.bf16.mxu1 (!%p421_p2), %vm1714_vm0, %v1713_v1  ;;  %s1717_s15 = smov (!%p421_p2), 80   ;;  %s1718_s16 = smov (!%p421_p2), 88   ;;  %vm1340_vm4 = vcmask (!%p421_p2), 523264  }
   0x8   : > { %1558 = vmatprep.subr.bf16.mxu1 (!%p421_p2), %v1713_v1  ;;  %1572 = vmatprep.mubr.msk.bf16.mxu0 (!%p421_p2), %vm1714_vm0, %v1713_v1  ;;  %s1719_s17 = smov (!%p421_p2), 112   ;;  %s1720_s18 = smov (!%p421_p2), 72  }
   0x9   : > { %s1721_s20 = smov (!%p421_p2), 104   ;;  %s1722_s21 = smov (!%p421_p2), 56  }
   0xa   : > { %s1724_s23 = smov (!%p421_p2), 40   ;;  %s1725_s24 = smov (!%p421_p2), 64  }
   0xb   : > { %1559 = vmatpush3.bf16.msra.mxu1 (!%p421_p2), %v1678_v2 }
   0xc   : > { %1564 = vmatprep.subr.bf16.mxu1 (!%p421_p2), %v1713_v1 }
   0xd   : > { %s2000_s30 = smov (!%p468_p3, %s1480_s30), 1 }
   0xe   : > { %s1822_s19 = sshll.u32 %s2000_s30, 3  ;;  %s1716_s30 = smov 96  }
   0xf   : > { %s471_s22 = scalar_lea.vmem %s1984_s0, %s1822_s19  ;;  %s475_s25 = scalar_lea.vmem %s1985_s1, %s1822_s19 }
  0x10   : > { %v1833_v3 = vld [vmem:[%s471_s22] sm:$0xff]  ;;  %s1723_s22 = smov 48  }
  0x11   : > { %v482_v4 = vld [vmem:[%s475_s25] sm:$0xff] }
  0x12   : > { %v483_v5 = vadd.f32 %v482_v4, %v1833_v3 }
  0x14   : > { %v484_v6 = vpack.c.bf16 %v1833_v3, %v483_v5 }
  0x16   : > { %1561 = vmatmul.mubr.msk.bf16.vlgmr.msra.gmra.mrb[0].mxu1 %vm508_vm1, %v484_v6 }
  0x17   : > { %1566 = vmatprep.mubr.msk.bf16.mxu1 %vm1714_vm0, %v1713_v1 }
  0xe9   : > { %v546_v8 = vpop.f32.mrb[0].mxu1 }
  0xea   : > { %v547_v9 = vadd.f32 %v1488_v7, %v546_v8  ;;  %v1562_v10 = vpop.f32.mrb[1].mxu1 }
  0xeb   : > { %v549_v11 = vpop.f32.mrb[2].mxu1 }
  0xec   : > { %v553_v12 = vpack.c.bf16 %v547_v9, %v547_v9  ;;  %v1843_v13 = vadd.f32 %v1488_v7, %v549_v11  ;;  %v1563_v14 = vpop.f32.mrb[3].mxu1 }
  0xee   : > { %605 = vrot.lane.b32.xlu1 %v553_v12, %s1715_s28  ;;  %556 = vrot.lane.b32.xlu0 %v553_v12, %s1716_s30  ;;  %v554_v56 = vpack.c.bf16 %v1843_v13, %v1843_v13 }
  0xf2   : > { %657 = vrot.lane.b32.xlu1 %v553_v12, %s1717_s15  ;;  %607 = vrot.lane.b32.xlu0 %v553_v12, %s1718_s16 }
  0xf6   : > { %655 = vrot.lane.b32.xlu1 %v553_v12, %s1719_s17  ;;  %707 = vrot.lane.b32.xlu0 %v553_v12, %s1720_s18  ;;  %s479_s18 = scalar_lea.vmem %s1998_s14, %s1822_s19 }
  0xfa   : > { %705 = vrot.lane.b32.xlu0 %v553_v12, %s1721_s20 }
 0x160   : > { %v606_v15 = vpop.permute.xlu1 %605  ;;  %v557_v16 = vpop.permute.xlu0 %556 }
 0x161   : > { %v563_v17 = vsel %vm558_vm2, %v557_v16, 0 }
 0x162   : > { %1565 = vmatpush3.bf16.xpose.msra.mxu1 %v563_v17 }
 0x163   : > { %1576 = vmatprep.subr.bf16.mxu1 %v1713_v1 }
 0x164   : > { %v608_v18 = vpop.permute.xlu0 %607  ;;  %v658_v20 = vpop.permute.xlu1 %657 }
 0x165   : > { %v613_v19 = vsel %vm558_vm2, %v608_v18, 0  ;;  %v663_v21 = vsel %vm558_vm2, %v658_v20, 0  ;;  %v904_v18 = vld [vmem:[%s1988_s4 + $0x4] sm:$0xf] }
 0x166   : > { %1571 = vmatpush3.bf16.xpose.msra.mxu0 %v613_v19  ;;  %v909_v20 = vsel %vm807_vm3, %v904_v18, 0 }
 0x167   : > { %1582 = vmatprep.subr.bf16.mxu0 %v1713_v1 }
 0x168   : > { %v708_v22 = vpop.permute.xlu0 %707  ;;  %v656_v24 = vpop.permute.xlu1 %655 }
 0x169   : > { %1567 = vmatmul.mubr.msk.bf16.vlgmr.msra.gmra.mrb[4].mxu1 %vm558_vm2, %v553_v12  ;;  %v713_v23 = vsel %vm558_vm2, %v708_v22, 0 }
 0x16a   : > { %1577 = vmatpush3.bf16.xpose.msra.mxu1 %v663_v21  ;;  %1578 = vmatprep.mubr.msk.bf16.mxu1 %vm1714_vm0, %v1713_v1 }
 0x16b   : > { %1588 = vmatprep.subr.bf16.mxu1 %v1713_v1 }
 0x16c   : > { %v706_v25 = vpop.permute.xlu0 %705 }
 0x16d   : > { %1573 = vmatmul.mubr.msk.bf16.vlgmr.msra.gmra.mrb[0].mxu0 %vm558_vm2, %v606_v15 }
 0x16e   : > { %1583 = vmatpush3.bf16.xpose.msra.mxu0 %v713_v23  ;;  %1584 = vmatprep.mubr.msk.bf16.mxu0 %vm1714_vm0, %v1713_v1 }
 0x16f   : > { %1594 = vmatprep.subr.bf16.mxu0 %v1713_v1 }
 0x171   : > { %1579 = vmatmul.mubr.msk.bf16.vlgmr.msra.gmra.mrb[8].mxu1 %vm558_vm2, %v656_v24 }
 0x172   : > { %1590 = vmatprep.mubr.msk.bf16.mxu1 %vm1714_vm0, %v1713_v1 }
 0x175   : > { %1585 = vmatmul.mubr.msk.bf16.vlgmr.msra.gmra.mrb[4].mxu0 %vm558_vm2, %v706_v25 }
 0x176   : > { %1596 = vmatprep.mubr.msk.bf16.mxu0 %vm1714_vm0, %v1713_v1 }
 0x23c   : > { %v599_v26 = vpop.f32.mrb[4].mxu1 }
 0x23d   : > { %v1568_v27 = vpop.f32.mrb[5].mxu1  ;;  %v755_v28 = vsel %vm558_vm2, %v599_v26, -inf }
 0x23e   : > { %756 = vmax.xlane.f32.xlu1 %v755_v28  ;;  %v602_v29 = vpop.f32.mrb[6].mxu1 }
 0x23f   : > { %v1569_v30 = vpop.f32.mrb[7].mxu1 }
 0x240   : > { %v649_v31 = vpop.f32.mrb[0].mxu0 }
 0x241   : > { %v1574_v32 = vpop.f32.mrb[1].mxu0  ;;  %v758_v33 = vsel %vm558_vm2, %v649_v31, -inf }
 0x242   : > { %759 = vmax.xlane.f32.xlu0 %v758_v33  ;;  %v652_v34 = vpop.f32.mrb[2].mxu0 }
 0x243   : > { %v1575_v35 = vpop.f32.mrb[3].mxu0 }
 0x244   : > { %v699_v36 = vpop.f32.mrb[8].mxu1 }
 0x245   : > { %v1580_v37 = vpop.f32.mrb[9].mxu1  ;;  %v761_v54 = vsel %vm558_vm2, %v699_v36, -inf }
 0x246   : > { %v702_v38 = vpop.f32.mrb[10].mxu1 }
 0x247   : > { %v1581_v39 = vpop.f32.mrb[11].mxu1  ;;  %v1046_v38 = vld [vmem:[%s1988_s4 + $0x8] sm:$0xf] }
 0x248   : > { %v749_v40 = vpop.f32.mrb[4].mxu0 }
 0x249   : > { %v1586_v41 = vpop.f32.mrb[5].mxu0  ;;  %v764_v55 = vsel %vm558_vm2, %v749_v40, -inf }
 0x24a   : > { %v752_v42 = vpop.f32.mrb[6].mxu0 }
 0x24b   : > { %v1587_v43 = vpop.f32.mrb[7].mxu0  ;;  %v1051_v42 = vsel %vm807_vm3, %v1046_v38, 0  ;;  %v1507_v38 = vld [vmem:[%s1991_s7] ss:$0 sm:$0xff] }
 0x2cb   : > { %v757_v44 = vpop.xlane.xlu1 %756 }
 0x2cc   : > { %v767_v45 = vsub.f32 %v599_v26, %v757_v44 }
 0x2ce   : > { %v771_v46 = vmul.f32 1.442695, %v767_v45 }
 0x2cf   : > { %v760_v47 = vpop.xlane.xlu0 %759 }
 0x2d0   : > { %1685 = vpow2.f32 %v771_v46  ;;  %v768_v48 = vsub.f32 %v649_v31, %v760_v47 }
 0x2d2   : > { %v773_v49 = vmul.f32 1.442695, %v768_v48 }
 0x2d4   : > { %1687 = vpow2.f32 %v773_v49  ;;  %v1145_v49 = vld [vmem:[%s1988_s4 + $0xc] sm:$0xf] }
 0x2da   : > { %v1686_v50 = vpop.eup %1685 }
 0x2db   : > { %v779_v51 = vsel %vm558_vm2, %v1686_v50, 0.0 }
 0x2dc   : > { %780 = vadd.xlane.f32.xlu0 %v779_v51 }
 0x2de   : > { %v1688_v52 = vpop.eup %1687 }
 0x2df   : > { %v782_v53 = vsel %vm558_vm2, %v1688_v52, 0.0 }
 0x2e0   : > { %783 = vadd.xlane.f32.xlu1 %v782_v53  ;;  %v1150_v53 = vsel %vm807_vm3, %v1145_v49, 0 }
 0x2e4   : > { %762 = vmax.xlane.f32.xlu1 %v761_v54 }
 0x2e8   : > { %765 = vmax.xlane.f32.xlu1 %v764_v55 }
 0x2f2   : > { %855 = vrot.lane.b32.xlu0 %v554_v56, %s1722_s21 }
 0x2f6   : > { %997 = vrot.lane.b32.xlu0 %v554_v56, %s1723_s22 }
 0x2fa   : > { %1096 = vrot.lane.b32.xlu0 %v554_v56, %s1724_s23 }
 0x369   : > { %v781_v57 = vpop.xlane.xlu0 %780 }
 0x36a   : > { %1689 = vrcp.f32 %v781_v57 }
 0x36d   : > { %v856_v58 = vpop.permute.xlu0 %855  ;;  %v784_v59 = vpop.xlane.xlu1 %783 }
 0x36e   : > { %v861_v60 = vsel %vm807_vm3, %v856_v58, 0  ;;  %1691 = vrcp.f32 %v784_v59 }
 0x36f   : > { %1595 = vmatpush3.bf16.msra.mxu0 %v861_v60 }
 0x370   : > { %1606 = vmatprep.subr.bf16.mxu0 %v1713_v1 }
 0x371   : > { %v763_v61 = vpop.xlane.xlu1 %762  ;;  %v998_v21 = vpop.permute.xlu0 %997 }
 0x372   : > { %v769_v62 = vsub.f32 %v699_v36, %v763_v61  ;;  %v1003_v27 = vsel %vm807_vm3, %v998_v21, 0  ;;  %v852_v36 = vld [vmem:[%s1988_s4] sm:$0xf] }
 0x373   : > { %v955_v37 = vsel %vm807_vm3, %v852_v36, 0  ;;  %v1683_v36 = vld [vmem:[%s1992_s8 + $0x10] sm:$0xff]  }
 0x374   : > { %v775_v63 = vmul.f32 1.442695, %v769_v62  ;;  %v1690_v2 = vpop.eup %1689 }
 0x375   : > { %v766_v0 = vpop.xlane.xlu1 %765  ;;  %v795_v7 = vmul.f32 %v1690_v2, %v1686_v50  ;;  %v1097_v32 = vpop.permute.xlu0 %1096 }
 0x376   : > { %1693 = vpow2.f32 %v775_v63  ;;  %v770_v4 = vsub.f32 %v749_v40, %v766_v0  ;;  %v1102_v34 = vsel %vm807_vm3, %v1097_v32, 0  ;;  %v1506_v32 = vld [vmem:[%s1995_s11] ss:$0 sm:$0xff] }
 0x378   : > { %v1692_v5 = vpop.eup %1691  ;;  %v777_v6 = vmul.f32 1.442695, %v770_v4 }
 0x379   : > { %v796_v8 = vmul.f32 %v1692_v5, %v1688_v52 }
 0x37a   : > { %1695 = vpow2.f32 %v777_v6 }
 0x37b   : > { %v799_v9 = vpack.c.bf16 %v796_v8, %v795_v7 }
 0x37d   : > { %v854_v10 = vrot.slane %v799_v9, 4 }
 0x37f   : > { %1597 = vmatmul.mubr.msk.bf16.vlgmr.msra.gmra.mrb[8].mxu0 %vm558_vm2, %v854_v10  ;;  %v1504_v10 = vld [vmem:[%s1989_s5] ss:$0 sm:$0xff] }
 0x380   : > { %v1694_v11 = vpop.eup %1693  ;;  %1608 = vmatprep.mubr.msk.bf16.mxu0 %vm1714_vm0, %v1713_v1  ;;  %1607 = vmatpush3.bf16.msra.mxu0 %v955_v37  ;;  %v1684_v37 = vld [vmem:[%s1992_s8 + $0x18] sm:$0xff]  }
 0x381   : > { %v785_v12 = vsel %vm558_vm2, %v1694_v11, 0.0  ;;  %1618 = vmatprep.subr.bf16.mxu0 %v1713_v1 }
 0x382   : > { %786 = vadd.xlane.f32.xlu1 %v785_v12 }
 0x384   : > { %v1696_v13 = vpop.eup %1695 }
 0x385   : > { %v788_v14 = vsel %vm558_vm2, %v1696_v13, 0.0 }
 0x386   : > { %789 = vadd.xlane.f32.xlu1 %v788_v14 }
 0x397   : > { %802 = vrot.lane.b32.xlu1 %v554_v56, %s1725_s24 }
 0x40f   : > { %v787_v15 = vpop.xlane.xlu1 %786 }
 0x413   : > { %v790_v16 = vpop.xlane.xlu1 %789 }
 0x414   : > { %1697 = vrcp.f32 %v790_v16 }
 0x415   : > { %1699 = vrcp.f32 %v787_v15 }
 0x417   : > { %v803_v17 = vpop.permute.xlu1 %802 }
 0x418   : > { %v809_v19 = vsel %vm807_vm3, %v803_v17, 0 }
 0x419   : > { %1589 = vmatpush3.bf16.msra.mxu1 %v809_v19 }
 0x41a   : > { %1600 = vmatprep.subr.bf16.mxu1 %v1713_v1 }
 0x41c   : > { %1591 = vmatmul.mubr.msk.bf16.vlgmr.msra.gmra.mrb[12].mxu1 %vm558_vm2, %v799_v9 }
 0x41d   : > { %1601 = vmatpush3.bf16.msra.mxu1 %v909_v20  ;;  %1602 = vmatprep.mubr.msk.bf16.mxu1 %vm1714_vm0, %v1713_v1 }
 0x41e   : > { %1612 = vmatprep.subr.bf16.mxu1 %v1713_v1  ;;  %v1698_v25 = vpop.eup %1697 }
 0x41f   : > { %v1700_v29 = vpop.eup %1699  ;;  %v798_v30 = vmul.f32 %v1698_v25, %v1696_v13  ;;  %v1682_v25 = vld [vmem:[%s1992_s8 + $0x8] sm:$0xff]  }
 0x420   : > { %v797_v31 = vmul.f32 %v1700_v29, %v1694_v11 }
 0x422   : > { %v800_v33 = vpack.c.bf16 %v798_v30, %v797_v31  ;;  %v1505_v30 = vld [vmem:[%s1994_s10] ss:$0 sm:$0xff] }
 0x424   : > { %v1095_v35 = vrot.slane %v800_v33, 4 }
 0x452   : > { %v897_v22 = vpop.f32.mrb[8].mxu0 }
 0x453   : > { %v903_v23 = vpack.c.bf16 %v897_v22, %v897_v22  ;;  %v1598_v24 = vpop.f32.mrb[9].mxu0 }
 0x454   : > { %v900_v26 = vpop.f32.mrb[10].mxu0  ;;  %v1680_v24 = vld [vmem:[%s1990_s6 + $0x8] sm:$0xff]  }
 0x455   : > { %v1599_v28 = vpop.f32.mrb[11].mxu0  ;;  %1603 = vmatmul.mubr.msk.bf16.vlgmr.msra.gmra.mrb[16].mxu1 %vm558_vm2, %v903_v23  ;;  %v1679_v23 = vld [vmem:[%s1990_s6] sm:$0xff]  }
 0x456   : > { %1613 = vmatpush3.bf16.msra.mxu1 %v1003_v27  ;;  %1614 = vmatprep.mubr.msk.bf16.mxu1 %vm1714_vm0, %v1713_v1 }
 0x457   : > { %1624 = vmatprep.subr.bf16.mxu1 %v1713_v1 }
 0x45d   : > { %1615 = vmatmul.mubr.msk.bf16.vlgmr.msra.gmra.mrb[20].mxu1 %vm558_vm2, %v800_v33 }
 0x45e   : > { %1625 = vmatpush3.bf16.msra.mxu1 %v1102_v34  ;;  %1626 = vmatprep.mubr.msk.bf16.mxu1 %vm1714_vm0, %v1713_v1 }
 0x45f   : > { %1636 = vmatprep.subr.bf16.mxu1 %v1713_v1 }
 0x465   : > { %1627 = vmatmul.mubr.msk.bf16.vlgmr.msra.gmra.mrb[24].mxu1 %vm558_vm2, %v1095_v35 }
 0x466   : > { %1640 = vmatprep.mubr.msk.bf16.mxu1 %vm1714_vm0, %v1713_v1  ;;  %1637 = vmatpush3.bf16.msra.mxu1 %v1679_v23 }
 0x467   : > { %1638 = vmatprep.subr.bf16.mxu1 %v1713_v1 }
 0x46a   : > { %1639 = vmatpush3.bf16.msra.mxu1 %v1680_v24 }
 0x4ef   : > { %v845_v39 = vpop.f32.mrb[12].mxu1 }
 0x4f0   : > { %v851_v40 = vpack.c.bf16 %v845_v39, %v845_v39  ;;  %v1592_v41 = vpop.f32.mrb[13].mxu1 }
 0x4f1   : > { %v848_v43 = vpop.f32.mrb[14].mxu1 }
 0x4f2   : > { %v1593_v44 = vpop.f32.mrb[15].mxu1  ;;  %1609 = vmatmul.mubr.msk.bf16.vlgmr.msra.gmra.mrb[12].mxu0 %vm558_vm2, %v851_v40 }
 0x4f3   : > { %1619 = vmatpush3.bf16.msra.mxu0 %v1051_v42  ;;  %1620 = vmatprep.mubr.msk.bf16.mxu0 %vm1714_vm0, %v1713_v1 }
 0x4f4   : > { %1630 = vmatprep.subr.bf16.mxu0 %v1713_v1 }
 0x528   : > { %v945_v45 = vpop.f32.mrb[16].mxu1 }
 0x529   : > { %v1604_v46 = vpop.f32.mrb[17].mxu1 }
 0x52a   : > { %v948_v47 = vpop.f32.mrb[18].mxu1 }
 0x52b   : > { %v1605_v48 = vpop.f32.mrb[19].mxu1 }
 0x530   : > { %v1039_v50 = vpop.f32.mrb[20].mxu1 }
 0x531   : > { %v1045_v51 = vpack.c.bf16 %v1039_v50, %v1039_v50  ;;  %v1616_v52 = vpop.f32.mrb[21].mxu1 }
 0x532   : > { %v1042_v54 = vpop.f32.mrb[22].mxu1 }
 0x533   : > { %v1617_v55 = vpop.f32.mrb[23].mxu1  ;;  %1621 = vmatmul.mubr.msk.bf16.vlgmr.msra.gmra.mrb[16].mxu0 %vm558_vm2, %v1045_v51 }
 0x534   : > { %1631 = vmatpush3.bf16.msra.mxu0 %v1150_v53  ;;  %1632 = vmatprep.mubr.msk.bf16.mxu0 %vm1714_vm0, %v1713_v1 }
 0x535   : > { %1644 = vmatprep.subr.bf16.mxu0 %v1713_v1 }
 0x538   : > { %v1138_v56 = vpop.f32.mrb[24].mxu1 }
 0x539   : > { %v1144_v57 = vpack.c.bf16 %v1138_v56, %v1138_v56  ;;  %v1628_v58 = vpop.f32.mrb[25].mxu1 }
 0x53a   : > { %v1141_v59 = vpop.f32.mrb[26].mxu1 }
 0x53b   : > { %v1629_v60 = vpop.f32.mrb[27].mxu1  ;;  %1633 = vmatmul.mubr.msk.bf16.vlgmr.msra.gmra.mrb[20].mxu0 %vm558_vm2, %v1144_v57 }
 0x53c   : > { %1652 = vmatprep.mubr.msk.bf16.mxu0 %vm1714_vm0, %v1713_v1 }
 0x5c5   : > { %v991_v61 = vpop.f32.mrb[12].mxu0 }
 0x5c6   : > { %v992_v62 = vadd.f32 %v991_v61, %v945_v45  ;;  %v1610_v63 = vpop.f32.mrb[13].mxu0 }
 0x5c7   : > { %v994_v0 = vpop.f32.mrb[14].mxu0 }
 0x5c8   : > { %v1611_v2 = vpop.f32.mrb[15].mxu0  ;;  %v1518_v0 = vld [vmem:[%s1997_s13] ss:$0 sm:$0xff] }
 0x606   : > { %v1087_v4 = vpop.f32.mrb[16].mxu0 }
 0x607   : > { %v1093_v5 = vadd.f32 %v1087_v4, %v992_v62  ;;  %v1622_v6 = vpop.f32.mrb[17].mxu0  ;;  %v1517_v62 = vld [vmem:[%s1996_s12] ss:$0 sm:$0xff] }
 0x608   : > { %v1090_v7 = vpop.f32.mrb[18].mxu0 }
 0x609   : > { %v1623_v8 = vpop.f32.mrb[19].mxu0 }
 0x60e   : > { %v1186_v9 = vpop.f32.mrb[20].mxu0 }
 0x60f   : > { %v1192_v11 = vadd.f32 %v1186_v9, %v1093_v5  ;;  %v1634_v12 = vpop.f32.mrb[21].mxu0 }
 0x610   : > { %v1189_v13 = vpop.f32.mrb[22].mxu0 }
 0x611   : > { %v1200_v14 = vadd.f32 %v1504_v10, %v1192_v11  ;;  %v1635_v15 = vpop.f32.mrb[23].mxu0 }
 0x613   : > { %v1201_v16 = vadd.f32 %v1200_v14, %v1833_v3  ;;  %v1681_v3 = vld [vmem:[%s1992_s8] sm:$0xff]  }
 0x614   : > { %1645 = vmatpush3.bf16.msra.mxu0 %v1681_v3 }
 0x615   : > { %v1202_v17 = vsel %vm508_vm1, %v1201_v16, 0.0  ;;  %1646 = vmatprep.subr.bf16.mxu0 %v1713_v1 }
 0x616   : > { %1203 = vadd.xlane.f32.xlu0 %v1202_v17 }
 0x618   : > { %1647 = vmatpush3.bf16.msra.mxu0 %v1682_v25 }
 0x619   : > { %1648 = vmatprep.subr.bf16.mxu0 %v1713_v1 }
 0x61c   : > { %1649 = vmatpush3.bf16.msra.mxu0 %v1683_v36 }
 0x61d   : > { %1650 = vmatprep.subr.bf16.mxu0 %v1713_v1  ;;  %v1511_v1 = vld [vmem:[%s1993_s9] ss:$0 sm:$0xff] }
 0x620   : > { %1651 = vmatpush3.bf16.msra.mxu0 %v1684_v37 }
 0x6a3   : > { %v1204_v18 = vpop.xlane.xlu0 %1203 }
 0x6a4   : > { %v1206_v19 = vmul.f32 0.03125, %v1204_v18 }
 0x6a6   : > { %v1207_v20 = vsub.f32 %v1201_v16, %v1206_v19 }
 0x6a8   : > { %v1208_v21 = vmul.f32 %v1207_v20, %v1207_v20 }
 0x6aa   : > { %v1209_v22 = vsel %vm508_vm1, %v1208_v21, 0.0 }
 0x6ab   : > { %1210 = vadd.xlane.f32.xlu1 %v1209_v22 }
 0x738   : > { %v1211_v26 = vpop.xlane.xlu1 %1210 }
 0x739   : > { %v1212_v27 = vmul.f32 0.03125, %v1211_v26 }
 0x73b   : > { %v1213_v28 = vadd.f32 1e-05, %v1212_v27 }
 0x73d   : > { %1701 = vrsqrt.f32 %v1213_v28 }
 0x747   : > { %v1702_v29 = vpop.eup %1701 }
 0x748   : > { %v1215_v31 = vmul.f32 %v1702_v29, %v1207_v20 }
 0x74a   : > { %v1223_v33 = vmul.f32 %v1505_v30, %v1215_v31 }
 0x74c   : > { %v1231_v34 = vadd.f32 %v1506_v32, %v1223_v33 }
 0x74e   : > { %v1232_v35 = vpack.c.bf16 %v1231_v34, %v1231_v34 }
 0x750   : > { %1641 = vmatmul.mubr.msk.bf16.vlgmr.msra.gmra.mrb[28].mxu1 %vm508_vm1, %v1232_v35 }
 0x823   : > { %v1293_v39 = vpop.f32.mrb[28].mxu1 }
 0x824   : > { %v1294_v40 = vadd.f32 %v1507_v38, %v1293_v39  ;;  %v1642_v41 = vpop.f32.mrb[29].mxu1 }
 0x825   : > { %v1296_v42 = vpop.f32.mrb[30].mxu1 }
 0x826   : > { %v1299_v43 = vmax.f32 %v1294_v40, 0.0  ;;  %v1643_v44 = vpop.f32.mrb[31].mxu1 }
 0x828   : > { %v1300_v45 = vpack.c.bf16 %v1299_v43, %v1299_v43 }
 0x82a   : > { %1653 = vmatmul.mubr.msk.bf16.vlgmr.msra.gmra.mrb[24].mxu0 %vm1340_vm4, %v1300_v45 }
 0x8fd   : > { %v1378_v46 = vpop.f32.mrb[24].mxu0 }
 0x8fe   : > { %v1379_v47 = vadd.f32 %v1511_v1, %v1378_v46  ;;  %v1654_v48 = vpop.f32.mrb[25].mxu0 }
 0x8ff   : > { %v1381_v49 = vpop.f32.mrb[26].mxu0 }
 0x900   : > { %v1655_v50 = vpop.f32.mrb[27].mxu0  ;;  %v1384_v51 = vadd.f32 %v1379_v47, %v1231_v34 }
 0x902   : > { %v1385_v52 = vsel %vm508_vm1, %v1384_v51, 0.0 }
 0x903   : > { %1386 = vadd.xlane.f32.xlu0 %v1385_v52 }
 0x990   : > { %v1387_v53 = vpop.xlane.xlu0 %1386 }
 0x991   : > { %v1388_v54 = vmul.f32 0.03125, %v1387_v53 }
 0x993   : > { %v1389_v55 = vsub.f32 %v1384_v51, %v1388_v54 }
 0x995   : > { %v1390_v56 = vmul.f32 %v1389_v55, %v1389_v55 }
 0x997   : > { %v1391_v57 = vsel %vm508_vm1, %v1390_v56, 0.0 }
 0x998   : > { %1392 = vadd.xlane.f32.xlu0 %v1391_v57 }
 0xa25   : > { %v1393_v58 = vpop.xlane.xlu0 %1392 }
 0xa26   : > { %v1394_v59 = vmul.f32 0.03125, %v1393_v58 }
 0xa28   : > { %v1395_v60 = vadd.f32 1e-05, %v1394_v59 }
 0xa2a   : > { %1703 = vrsqrt.f32 %v1395_v60 }
 0xa34   : > { %v1704_v61 = vpop.eup %1703 }
 0xa35   : > { %v1397_v63 = vmul.f32 %v1704_v61, %v1389_v55 }
 0xa37   : > { %v1405_v2 = vmul.f32 %v1517_v62, %v1397_v63 }
 0xa39   : > { %v1413_v4 = vadd.f32 %v1518_v0, %v1405_v2 }
 0xa3b   : > { %1414 = vst.msk [vmem:[%s479_s18] sm:$0xff] %vm508_vm1, %v1413_v4 }
 0xa3c PF: > { %s24_s29 = sadd.s32 1, %s1711_s29  }
 0xa3d   : > { %p21_p4 = scmp.ge.s32.totalorder %s24_s29, 4  }
 0xa3f   :  { %23 = sbr.rel (!%p21_p4) target bundleno = 1 (0x1), region = 109 }

</bundles_post_ra>
